<compile_context>
chip_gen: v7x
topology: tpu7x:2x2x1
jax: 0.10.0
libtpu: 0.0.40
codegen_flags: <defaults>
</compile_context>

<pallas_src>
import functools

import jax
import jax.numpy as jnp
from jax.experimental import pallas as pl
from jax.experimental.pallas import tpu as pltpu


def _round_up(x, m):
    return ((x + m - 1) // m) * m


@functools.lru_cache(maxsize=None)
def _vmem_limit_bytes():
    # v5e/v6e: 128 MiB VMEM -> allow large tiles; v7x: 64 MiB -> stay well under.
    try:
        cap = pltpu.get_tpu_info().vmem_capacity_bytes
        return int(min(96 * 1024 * 1024, cap * 0.6))
    except Exception:
        return 48 * 1024 * 1024


# --------------------------------------------------------------------------- #
# Fused matmul + bias + activation (MXU): 1x1 convs, stem (im2col), head conv
# --------------------------------------------------------------------------- #

def _matmul_bias_act_kernel(x_ref, w_ref, b_ref, o_ref, *, act):
    y = jnp.dot(x_ref[...], w_ref[...], preferred_element_type=jnp.float32)
    y = y + b_ref[...]                       # (1, bn) broadcast over rows, f32
    if act == "silu":
        y = y * jax.nn.sigmoid(y)
    elif act == "sigmoid":
        y = jax.nn.sigmoid(y)
    o_ref[...] = y.astype(o_ref.dtype)


def matmul_bias_act(x, w, b, act="none", out_dtype=None):
    """x: (M, K), w: (K, N), b: (N,) f32 -> (M, N)."""
    M, K = x.shape
    Kw, N = w.shape
    assert K == Kw
    out_dtype = out_dtype or x.dtype
    # dtype-aware sublane alignment: bf16 min tile is (16, 128)
    min_m = 16 if x.dtype == jnp.bfloat16 else 8
    if M % 512 == 0 and M >= 512:
        bm = 512
    elif M % 256 == 0 and M >= 256:
        bm = 256
    elif M % 128 == 0 and M >= 128:
        bm = 128
    elif M > 256:
        bm = 256                              # pad the tail block
    else:
        bm = _round_up(M, min_m)
    Mp = _round_up(M, bm)
    if Mp != M:
        x = jnp.pad(x, ((0, Mp - M), (0, 0)))
    # N tiling: largest of 512/256/128 that divides N, else whole N.
    bn = N
    for cand in (512, 256, 128):
        if N % cand == 0:
            bn = cand
            break
    out = pl.pallas_call(
        functools.partial(_matmul_bias_act_kernel, act=act),
        out_shape=jax.ShapeDtypeStruct((Mp, N), out_dtype),
        grid_spec=pltpu.PrefetchScalarGridSpec(
            num_scalar_prefetch=0,
            grid=(Mp // bm, N // bn),
            in_specs=[
                pl.BlockSpec((bm, K), lambda i, j: (i, 0)),
                pl.BlockSpec((K, bn), lambda i, j: (0, j)),
                pl.BlockSpec((1, bn), lambda i, j: (0, j)),
            ],
            out_specs=pl.BlockSpec((bm, bn), lambda i, j: (i, j)),
        ),
        compiler_params=pltpu.CompilerParams(
            dimension_semantics=("parallel", "parallel"),
            vmem_limit_bytes=_vmem_limit_bytes(),
        ),
    )(x, w, b.reshape(1, N).astype(jnp.float32))
    return out[:M] if Mp != M else out


def pointwise_conv(x, w, b, act):
    n, hh, ww, c = x.shape
    y = matmul_bias_act(x.reshape(n * hh * ww, c), w, b, act=act)
    return y.reshape(n, hh, ww, w.shape[1])


# --------------------------------------------------------------------------- #
# Depthwise KxK conv + bias + SiLU (VPU), with the SE global-avg-pool fused in
# --------------------------------------------------------------------------- #

def _dwconv_silu_kernel(x_ref, w_ref, b_ref, o_ref, gap_ref, xpad_ref,
                        *, k, stride, pad):
    h_in, w_in = x_ref.shape[1], x_ref.shape[2]
    ho, wo = o_ref.shape[1], o_ref.shape[2]
    hp, wp, c = xpad_ref.shape
    # Fill the padded input in VMEM scratch: interior from x, then zero only the
    # four thin border slabs (no full-map zero-fill store pass).
    xpad_ref[pl.ds(pad, h_in), pl.ds(pad, w_in), :] = x_ref[0].astype(jnp.float32)
    if pad > 0:
        xpad_ref[pl.ds(0, pad), :, :] = jnp.zeros((pad, wp, c), jnp.float32)
        xpad_ref[pl.ds(hp - pad, pad), :, :] = jnp.zeros((pad, wp, c), jnp.float32)
        xpad_ref[:, pl.ds(0, pad), :] = jnp.zeros((hp, pad, c), jnp.float32)
        xpad_ref[:, pl.ds(wp - pad, pad), :] = jnp.zeros((hp, pad, c), jnp.float32)

    w_all = w_ref[...]                       # (k*k, C), hoisted out of the tap loop
    bias = b_ref[...]                        # (1, C)
    acc = jnp.zeros(o_ref.shape[1:], jnp.float32)
    tap = 0
    for dy in range(k):
        for dx in range(k):
            # Ref-level (strided) slice: the stride is applied at load time, so
            # stride-2 stages only read / compute the outputs that are kept.
            if stride == 1:
                xs = xpad_ref[pl.ds(dy, ho), pl.ds(dx, wo), :]
            else:
                xs = xpad_ref[pl.ds(dy, ho, stride), pl.ds(dx, wo, stride), :]
            acc = acc + xs * w_all[tap]
            tap += 1
    acc = acc + bias
    act = acc * jax.nn.sigmoid(acc)          # SiLU (dw conv is always followed by SiLU)
    o_ref[...] = act[None].astype(o_ref.dtype)
    # Fused SE squeeze: global average pool over spatial dims, f32, no extra HBM read.
    gap_ref[...] = jnp.mean(act, axis=(0, 1), keepdims=True)


def depthwise_conv_silu(x, w, b, k, stride, pad):
    """x: (N, H, W, C) NHWC bf16; w: (k*k, C) f32; b: (C,) f32 -> (y, gap (N, C) f32)."""
    n, h, wd, c = x.shape
    hp, wp = h + 2 * pad, wd + 2 * pad
    ho = (hp - k) // stride + 1
    wo = (wp - k) // stride + 1
    y, gap = pl.pallas_call(
        functools.partial(_dwconv_silu_kernel, k=k, stride=stride, pad=pad),
        out_shape=(jax.ShapeDtypeStruct((n, ho, wo, c), x.dtype),
                   jax.ShapeDtypeStruct((n, 1, c), jnp.float32)),
        grid_spec=pltpu.PrefetchScalarGridSpec(
            num_scalar_prefetch=0,
            grid=(n,),
            in_specs=[
                pl.BlockSpec((1, h, wd, c), lambda i: (i, 0, 0, 0)),
                pl.BlockSpec((k * k, c), lambda i: (0, 0)),
                pl.BlockSpec((1, c), lambda i: (0, 0)),
            ],
            out_specs=[
                pl.BlockSpec((1, ho, wo, c), lambda i: (i, 0, 0, 0)),
                pl.BlockSpec((1, 1, c), lambda i: (i, 0, 0)),
            ],
            scratch_shapes=[pltpu.VMEM((hp, wp, c), jnp.float32)],
        ),
        compiler_params=pltpu.CompilerParams(
            dimension_semantics=("parallel",),
            vmem_limit_bytes=_vmem_limit_bytes(),
        ),
    )(x, w, b.reshape(1, c).astype(jnp.float32))
    return y, gap.reshape(n, c)


# --------------------------------------------------------------------------- #
# Batched Squeeze-and-Excitation FC stage: FC1(SiLU) + FC2(sigmoid), one call per block
# --------------------------------------------------------------------------- #

def _se_fc_kernel(g_ref, w1_ref, b1_ref, w2_ref, b2_ref, o_ref):
    t = jnp.dot(g_ref[...], w1_ref[...],
                preferred_element_type=jnp.float32) + b1_ref[...]
    t = t * jax.nn.sigmoid(t)                                           # SiLU
    u = jnp.dot(t, w2_ref[...],
                preferred_element_type=jnp.float32) + b2_ref[...]
    o_ref[...] = jax.nn.sigmoid(u)


def se_fc(gap, w1, b1, w2, b2):
    """gap: (N, Cexp) f32 -> per-channel scale (N, Cexp) f32 in ONE batched call."""
    n, c = gap.shape
    csq = w1.shape[1]
    return pl.pallas_call(
        _se_fc_kernel,
        out_shape=jax.ShapeDtypeStruct((n, c), jnp.float32),
        grid_spec=pltpu.PrefetchScalarGridSpec(
            num_scalar_prefetch=0,
            grid=(1,),
            in_specs=[
                pl.BlockSpec((n, c), lambda i: (0, 0)),
                pl.BlockSpec((c, csq), lambda i: (0, 0)),
                pl.BlockSpec((1, csq), lambda i: (0, 0)),
                pl.BlockSpec((csq, c), lambda i: (0, 0)),
                pl.BlockSpec((1, c), lambda i: (0, 0)),
            ],
            out_specs=pl.BlockSpec((n, c), lambda i: (0, 0)),
        ),
        compiler_params=pltpu.CompilerParams(dimension_semantics=("arbitrary",)),
    )(gap, w1, b1.reshape(1, csq), w2, b2.reshape(1, c))


# --------------------------------------------------------------------------- #
# Projection 1x1 conv with fused SE re-scale (bf16 prologue) and residual add (epilogue)
# --------------------------------------------------------------------------- #

def _proj_kernel(x_ref, s_ref, w_ref, b_ref, *rest, has_residual):
    if has_residual:
        r_ref, o_ref = rest
    else:
        (o_ref,) = rest
    # SE channel re-scale fused into the matmul prologue, done in bf16 (no f32 copy
    # of the expanded map; MXU accumulation is f32 anyway).
    x = x_ref[0] * s_ref[0].astype(x_ref.dtype)                  # (hw, K) * (1, K)
    y = jnp.dot(x, w_ref[...], preferred_element_type=jnp.float32)
    y = y + b_ref[...]
    if has_residual:
        y = y + r_ref[0].astype(jnp.float32)                     # fused residual add
    o_ref[...] = y[None].astype(o_ref.dtype)


def project_conv(h, s, w, b, residual=None):
    n, hh, ww, k_in = h.shape
    hw = hh * ww
    cout = w.shape[1]
    args = [h.reshape(n, hw, k_in), s.reshape(n, 1, k_in), w,
            b.reshape(1, cout).astype(jnp.float32)]
    in_specs = [
        pl.BlockSpec((1, hw, k_in), lambda i: (i, 0, 0)),
        pl.BlockSpec((1, 1, k_in), lambda i: (i, 0, 0)),
        pl.BlockSpec((k_in, cout), lambda i: (0, 0)),
        pl.BlockSpec((1, cout), lambda i: (0, 0)),
    ]
    has_res = residual is not None
    if has_res:
        args.append(residual.reshape(n, hw, cout))
        in_specs.append(pl.BlockSpec((1, hw, cout), lambda i: (i, 0, 0)))
    out = pl.pallas_call(
        functools.partial(_proj_kernel, has_residual=has_res),
        out_shape=jax.ShapeDtypeStruct((n, hw, cout), h.dtype),
        grid_spec=pltpu.PrefetchScalarGridSpec(
            num_scalar_prefetch=0,
            grid=(n,),
            in_specs=in_specs,
            out_specs=pl.BlockSpec((1, hw, cout), lambda i: (i, 0, 0)),
        ),
        compiler_params=pltpu.CompilerParams(
            dimension_semantics=("parallel",),
            vmem_limit_bytes=_vmem_limit_bytes(),
        ),
    )(*args)
    return out.reshape(n, hh, ww, cout)


# --------------------------------------------------------------------------- #
# Fused global average pool + classifier Linear (backbone head), one batched call
# --------------------------------------------------------------------------- #

def _gap_fc_kernel(x_ref, w_ref, b_ref, o_ref):
    g = jnp.mean(x_ref[...].astype(jnp.float32), axis=1)        # (N, C)
    y = jnp.dot(g.astype(w_ref.dtype), w_ref[...],
                preferred_element_type=jnp.float32) + b_ref[...]
    o_ref[...] = y


def gap_classifier(x, w, b):
    """x: (N, H, W, C) bf16 -> logits (N, num_classes) f32 (GAP + Linear fused)."""
    n, h, wd, c = x.shape
    hw = h * wd
    ncls = w.shape[1]
    return pl.pallas_call(
        _gap_fc_kernel,
        out_shape=jax.ShapeDtypeStruct((n, ncls), jnp.float32),
        grid_spec=pltpu.PrefetchScalarGridSpec(
            num_scalar_prefetch=0,
            grid=(1,),
            in_specs=[
                pl.BlockSpec((n, hw, c), lambda i: (0, 0, 0)),
                pl.BlockSpec((c, ncls), lambda i: (0, 0)),
                pl.BlockSpec((1, ncls), lambda i: (0, 0)),
            ],
            out_specs=pl.BlockSpec((n, ncls), lambda i: (0, 0)),
        ),
        compiler_params=pltpu.CompilerParams(dimension_semantics=("arbitrary",)),
    )(x.reshape(n, hw, c), w, b.reshape(1, ncls).astype(jnp.float32))


# --------------------------------------------------------------------------- #
# Glue: im2col (stem), block configs, params, MBConv, full forward
# --------------------------------------------------------------------------- #

def im2col(x, k, stride, pad):
    """x: (N, H, W, C) -> (N*Ho*Wo, K*K*C) patches (conv-as-matmul for the stem only)."""
    # TODO(synk): replace with an in-kernel tap-loop gather at full 224x224 resolution.
    n, h, w, c = x.shape
    xp = jnp.pad(x, ((0, 0), (pad, pad), (pad, pad), (0, 0)))
    ho = (h + 2 * pad - k) // stride + 1
    wo = (w + 2 * pad - k) // stride + 1
    cols = []
    for dy in range(k):
        for dx in range(k):
            cols.append(xp[:, dy:dy + stride * ho:stride, dx:dx + stride * wo:stride, :])
    patches = jnp.concatenate(cols, axis=-1)            # (N, Ho, Wo, K*K*C)
    return patches.reshape(n * ho * wo, k * k * c), (n, ho, wo)


def b0_block_configs():
    # (expand_ratio, kernel, stride, in_ch, out_ch, num_layers) -- EfficientNet-B0
    stages = [
        (1, 3, 1, 32, 16, 1),
        (6, 3, 2, 16, 24, 2),
        (6, 5, 2, 24, 40, 2),
        (6, 3, 2, 40, 80, 3),
        (6, 5, 1, 80, 112, 3),
        (6, 5, 2, 112, 192, 4),
        (6, 3, 1, 192, 320, 1),
    ]
    cfgs = []
    for (e, k, s, cin, cout, nrep) in stages:
        for i in range(nrep):
            cfgs.append(dict(expand=e, k=k,
                             stride=s if i == 0 else 1,
                             cin=cin if i == 0 else cout,
                             cout=cout))
    return cfgs


class KeyGen:
    def __init__(self, key):
        self.key = key

    def __call__(self):
        self.key, sub = jax.random.split(self.key)
        return sub


def _wb(kg, fan_in, shape_w, shape_b, w_dtype=jnp.bfloat16):
    w = (jax.random.normal(kg(), shape_w, jnp.float32)
         / jnp.sqrt(float(fan_in))).astype(w_dtype)
    b = jax.random.normal(kg(), shape_b, jnp.float32) * 0.01
    return w, b


def init_params(key, num_classes=9):
    kg = KeyGen(key)
    params = {}
    # stem: Conv 3x3/2 (3 -> 32), BN folded, SiLU.  (Tap-major, channel-minor K layout;
    # real torchvision weights would need the matching reshape.)
    params["stem_w"], params["stem_b"] = _wb(kg, 3 * 3 * 3, (3 * 3 * 3, 32), (32,))
    blocks = []
    for cfg in b0_block_configs():
        cin, cout, k, e = cfg["cin"], cfg["cout"], cfg["k"], cfg["expand"]
        cexp = cin * e
        csq = max(1, cin // 4)
        p = {}
        if e != 1:
            p["exp_w"], p["exp_b"] = _wb(kg, cin, (cin, cexp), (cexp,))
        # depthwise weights / SE weights stay f32 (VPU / tiny matmuls)
        p["dw_w"], p["dw_b"] = _wb(kg, k * k, (k * k, cexp), (cexp,), w_dtype=jnp.float32)
        p["se1_w"], p["se1_b"] = _wb(kg, cexp, (cexp, csq), (csq,), w_dtype=jnp.float32)
        p["se2_w"], p["se2_b"] = _wb(kg, csq, (csq, cexp), (cexp,), w_dtype=jnp.float32)
        p["proj_w"], p["proj_b"] = _wb(kg, cexp, (cexp, cout), (cout,))
        blocks.append(p)
    params["blocks"] = blocks
    # head: Conv 1x1 (320 -> 1280), BN folded, SiLU
    params["head_w"], params["head_b"] = _wb(kg, 320, (320, 1280), (1280,))
    # classifier: Dropout(0.2) [identity at eval] + Linear(1280 -> num_classes)
    params["fc_w"], params["fc_b"] = _wb(kg, 1280, (1280, num_classes), (num_classes,))
    return params


def mbconv(x, p, cfg):
    inp = x
    h = x
    if cfg["expand"] != 1:
        h = pointwise_conv(h, p["exp_w"], p["exp_b"], act="silu")
    # Depthwise conv with fused SiLU and fused SE global-avg-pool (second output).
    h, gap = depthwise_conv_silu(h, p["dw_w"], p["dw_b"],
                                 cfg["k"], cfg["stride"], (cfg["k"] - 1) // 2)
    # Batched SE FC1(SiLU)/FC2(sigmoid) -> per-channel scale (N, Cexp) f32.
    s = se_fc(gap, p["se1_w"], p["se1_b"], p["se2_w"], p["se2_b"])
    # Projection matmul with SE re-scale (bf16 prologue) + residual fused in.
    use_res = cfg["stride"] == 1 and cfg["cin"] == cfg["cout"]
    h = project_conv(h, s, p["proj_w"], p["proj_b"],
                     residual=inp if use_res else None)
    return h


def efficientnet_classifier_forward(params, x_nchw):
    """Forward pass matching EfficientNetClassifier(num_classes=9).forward (eval mode)."""
    x = jnp.transpose(x_nchw, (0, 2, 3, 1)).astype(jnp.bfloat16)          # NCHW -> NHWC, bf16
    # stem (conv-as-matmul)
    cols, (n, ho, wo) = im2col(x, k=3, stride=2, pad=1)
    h = matmul_bias_act(cols, params["stem_w"], params["stem_b"], act="silu")
    h = h.reshape(n, ho, wo, 32)
    # MBConv stages
    for p, cfg in zip(params["blocks"], b0_block_configs()):
        h = mbconv(h, p, cfg)
    # head conv 1x1 -> 1280
    h = pointwise_conv(h, params["head_w"], params["head_b"], act="silu")
    # adaptive avg pool (1,1) + flatten + Linear, fused in one kernel.
    # TODO(synk): Dropout(p=0.2) is identity in eval mode, so it is omitted here.
    logits = gap_classifier(h, params["fc_w"], params["fc_b"])
    return logits                                                         # (N, 9) f32


# --------------------------------------------------------------------------- #
# Driver
# --------------------------------------------------------------------------- #

if __name__ == "__main__":
    key = jax.random.PRNGKey(0)
    k_params, k_input = jax.random.split(key)

    num_classes = 9
    params = init_params(k_params, num_classes=num_classes)

    # Small NCHW image batch (3 channels as required by EfficientNet-B0 stem).
    x = jax.random.normal(k_input, (2, 3, 16, 16), jnp.float32)

    logits = efficientnet_classifier_forward(params, x)
    logits = jax.block_until_ready(logits)

    assert logits.shape == (2, num_classes), logits.shape
    assert jnp.all(jnp.isfinite(logits))
    print("KERNEL_OK")
</pallas_src>

<mosaic_0001>
module attributes {stable_mosaic.version = 11 : i64} {
  func.func @_matmul_bias_act_kernel(%arg0: i32, %arg1: i32, %arg2: memref<128x27xbf16, #tpu.memory_space<vmem>>, %arg3: memref<27x32xbf16, #tpu.memory_space<vmem>>, %arg4: memref<1x32xf32, #tpu.memory_space<vmem>>, %arg5: memref<128x32xbf16, #tpu.memory_space<vmem>>) attributes {dimension_semantics = [#tpu.dimension_semantics<parallel>, #tpu.dimension_semantics<parallel>], iteration_bounds = array<i64: 1, 1>, scalar_prefetch = 0 : i64, scratch_operands = 0 : i64, tpu.core_type = #tpu.core_type<tc>, window_params = [{transform_indices = @transform_0, window_bounds = array<i64: 128, 27>}, {transform_indices = @transform_1, window_bounds = array<i64: 27, 32>}, {transform_indices = @transform_2, window_bounds = array<i64: 1, 32>}, {transform_indices = @transform_3, window_bounds = array<i64: 128, 32>}]} {
    %c0 = arith.constant 0 : index
    %c0_0 = arith.constant 0 : index
    %0 = vector.load %arg2[%c0, %c0_0] : memref<128x27xbf16, #tpu.memory_space<vmem>>, vector<128x27xbf16>
    %c0_1 = arith.constant 0 : index
    %c0_2 = arith.constant 0 : index
    %1 = vector.load %arg3[%c0_1, %c0_2] : memref<27x32xbf16, #tpu.memory_space<vmem>>, vector<27x32xbf16>
    %cst = arith.constant dense<0.000000e+00> : vector<128x32xf32>
    %2 = tpu.matmul %0, %1, %cst {dimension_numbers = #tpu.dot_dimension_numbers<[1], [0], [0], [1], [0, 0, 1, 1], [], []>} : vector<128x27xbf16>, vector<27x32xbf16>, vector<128x32xf32> -> vector<128x32xf32>
    %c0_3 = arith.constant 0 : index
    %c0_4 = arith.constant 0 : index
    %3 = vector.load %arg4[%c0_3, %c0_4] : memref<1x32xf32, #tpu.memory_space<vmem>>, vector<1x32xf32>
    %4 = vector.broadcast %3 : vector<1x32xf32> to vector<128x32xf32>
    %5 = arith.addf %2, %4 : vector<128x32xf32>
    %6 = arith.negf %5 : vector<128x32xf32>
    %7 = math.exp %6 : vector<128x32xf32>
    %cst_5 = arith.constant 1.000000e+00 : f32
    %8 = vector.broadcast %cst_5 : f32 to vector<128x32xf32>
    %9 = arith.addf %8, %7 : vector<128x32xf32>
    %10 = arith.divf %8, %9 : vector<128x32xf32>
    %11 = arith.mulf %5, %10 : vector<128x32xf32>
    %12 = arith.truncf %11 : vector<128x32xf32> to vector<128x32xbf16>
    %c0_6 = arith.constant 0 : index
    %c0_7 = arith.constant 0 : index
    %13 = vector.load %arg5[%c0_6, %c0_7] : memref<128x32xbf16, #tpu.memory_space<vmem>>, vector<128x32xbf16>
    tpu.vector_store %arg5[%c0_6, %c0_7], %12 {strides = array<i32>} : memref<128x32xbf16, #tpu.memory_space<vmem>>, vector<128x32xbf16>,
    return
  }
  func.func @transform_0(%arg0: i32, %arg1: i32) -> (i32, i32) {
    %c0_i32 = arith.constant 0 : i32
    %c0_i32_0 = arith.constant 0 : i32
    return %arg0, %c0_i32 : i32, i32
  }
  func.func @transform_1(%arg0: i32, %arg1: i32) -> (i32, i32) {
    %c0_i32 = arith.constant 0 : i32
    %c0_i32_0 = arith.constant 0 : i32
    return %c0_i32, %arg1 : i32, i32
  }
  func.func @transform_2(%arg0: i32, %arg1: i32) -> (i32, i32) {
    %c0_i32 = arith.constant 0 : i32
    %c0_i32_0 = arith.constant 0 : i32
    return %c0_i32, %arg1 : i32, i32
  }
  func.func @transform_3(%arg0: i32, %arg1: i32) -> (i32, i32) {
    %c0_i32 = arith.constant 0 : i32
    return %arg0, %arg1 : i32, i32
  }
}

</mosaic_0001>

<bundles_post_ra>
// kernel: tpu_custom_call.1
= control target key start
LH: loop header
LB: loop body
LE: loop exit
PB: predicated region body
PF: predicated region fallthrough
CT: control target
= control target key end

     0   :  { %vm118_vm0 = vcmask 1044480   ;;  %vm119_vm1 = vcmask 1045504   ;;  %vm93_vm2 = vcmask 220160   ;;  %v595_v1 = vmov 65535   ;;  %s803_s1 = inlined_call_operand.vmem [shape: bf16[27,32], index: 1, kind: input, shape index: {}]   ;;  %s804_s0 = inlined_call_operand.vmem [shape: bf16[128,27], index: 0, kind: input, shape index: {}]   ;;  %s805_s2 = inlined_call_operand.vmem [shape: f32[1,32], index: 2, kind: input, shape index: {}]   ;;  %s806_s3 = inlined_call_operand.vmem [shape: bf16[128,32], index: 3, kind: output, shape index: {}]  }
   0x1   :  { %v521_v0 = vld [vmem:[%s803_s1] sm:$0xff]   ;;  %v120_v2 = vsel %vm118_vm0, 4294967295, %v595_v1  ;;  %v522_v3 = vld [vmem:[%s803_s1 + $0x8] sm:$0x3f]   ;;  %v527_v10 = vld [vmem:[%s804_s0 + $0x10] sm:$0xff]   ;;  %vm398_vm3 = vcmask 257024  }
   0x2   :  { %496 = vmatprep.subr.bf16.mxu0 %v521_v0  ;;  %516 = vmatprep.subr.bf16.mxu1 %v521_v0  ;;  %v121_v4 = vsel %vm119_vm1, %v120_v2, 0  ;;  %v523_v5 = vld [vmem:[%s804_s0] sm:$0xff]   ;;  %v525_v8 = vld [vmem:[%s804_s0 + $0x8] sm:$0xff]   ;;  %v528_v11 = vld [vmem:[%s804_s0 + $0x30] sm:$0xff]  }
   0x3   :  { %497 = vmatpush3.bf16.msra.mxu0 %v521_v0  ;;  %518 = vmatpush3.bf16.msra.mxu1 %v521_v0  ;;  %v123_v6 = vand.u32 %v522_v3, %v121_v4  ;;  %v524_v7 = vld [vmem:[%s804_s0 + $0x20] sm:$0xff]   ;;  %v526_v9 = vld [vmem:[%s804_s0 + $0x28] sm:$0xff]   ;;  %v529_v12 = vld [vmem:[%s804_s0 + $0x18] sm:$0xff]  }
   0x4   :  { %500 = vmatprep.mubr.msk.bf16.mxu0 %vm93_vm2, %v523_v5  ;;  %508 = vmatprep.mubr.msk.bf16.mxu1 %vm93_vm2, %v524_v7  ;;  %v530_v13 = vld [vmem:[%s804_s0 + $0x38] sm:$0xff]   ;;  %v657_v14 = vld [vmem:[%s805_s2] ss:$0 sm:$0xff] }
   0x5   :  { %498 = vmatprep.subr.bf16.mxu0 %v123_v6  ;;  %517 = vmatprep.subr.bf16.mxu1 %v123_v6 }
   0x7   :  { %499 = vmatpush3.bf16.msra.mxu0 %v123_v6  ;;  %519 = vmatpush3.bf16.msra.mxu1 %v123_v6 }
   0xa   :  { %501 = vmatmul.mubr.msk.bf16.vlgmr.msra.gmra.mrb[0].mxu0 %vm93_vm2, %v525_v8  ;;  %509 = vmatmul.mubr.msk.bf16.vlgmr.msra.gmra.mrb[0].mxu1 %vm93_vm2, %v526_v9 }
   0xb   :  { %504 = vmatprep.mubr.msk.bf16.mxu0 %vm93_vm2, %v527_v10  ;;  %512 = vmatprep.mubr.msk.bf16.mxu1 %vm93_vm2, %v528_v11 }
  0x12   :  { %505 = vmatmul.mubr.msk.bf16.gmra.mrb[4].mxu0 %vm93_vm2, %v529_v12  ;;  %513 = vmatmul.mubr.msk.bf16.gmra.mrb[4].mxu1 %vm93_vm2, %v530_v13 }
  0xdd   :  { %v502_v15 = vpop.f32.mrb[0].mxu0  ;;  %v510_v16 = vpop.f32.mrb[0].mxu1 }
  0xde   :  { %v660_v17 = vadd.f32 %v502_v15, %v657_v14  ;;  %v663_v18 = vadd.f32 %v510_v16, %v657_v14  ;;  %v159_v19 = vpop.f32.mrb[1].mxu0  ;;  %v191_v20 = vpop.f32.mrb[1].mxu1 }
  0xdf   :  { %v666_v21 = vadd.f32 %v657_v14, %v159_v19  ;;  %v669_v22 = vadd.f32 %v657_v14, %v191_v20  ;;  %v503_v23 = vpop.f32.mrb[2].mxu0  ;;  %v511_v24 = vpop.f32.mrb[2].mxu1 }
  0xe0   :  { %v440_v25 = vmul.f32 -1.442695, %v660_v17  ;;  %v448_v26 = vmul.f32 -1.442695, %v663_v18  ;;  %v674_v27 = vadd.f32 %v503_v23, %v657_v14  ;;  %v677_v28 = vadd.f32 %v511_v24, %v657_v14  ;;  %v162_v29 = vpop.f32.mrb[3].mxu0  ;;  %v194_v30 = vpop.f32.mrb[3].mxu1 }
  0xe1   :  { %v438_v31 = vmul.f32 -1.442695, %v666_v21  ;;  %v446_v32 = vmul.f32 -1.442695, %v669_v22  ;;  %v682_v33 = vadd.f32 %v657_v14, %v162_v29  ;;  %v685_v34 = vadd.f32 %v657_v14, %v194_v30 }
  0xe2   :  { %531 = vpow2.f32 %v440_v25  ;;  %v441_v35 = vmul.f32 -1.442695, %v674_v27  ;;  %v449_v36 = vmul.f32 -1.442695, %v677_v28 }
  0xe3   :  { %533 = vpow2.f32 %v448_v26  ;;  %v439_v37 = vmul.f32 -1.442695, %v682_v33  ;;  %v447_v38 = vmul.f32 -1.442695, %v685_v34 }
  0xe4   :  { %535 = vpow2.f32 %v438_v31 }
  0xe5   :  { %537 = vpow2.f32 %v446_v32  ;;  %v506_v39 = vpop.f32.mrb[4].mxu0  ;;  %v514_v40 = vpop.f32.mrb[4].mxu1 }
  0xe6   :  { %539 = vpow2.f32 %v441_v35  ;;  %v692_v41 = vadd.f32 %v506_v39, %v657_v14  ;;  %v695_v42 = vadd.f32 %v514_v40, %v657_v14  ;;  %v175_v43 = vpop.f32.mrb[5].mxu0  ;;  %v207_v44 = vpop.f32.mrb[5].mxu1 }
  0xe7   :  { %541 = vpow2.f32 %v449_v36  ;;  %v698_v45 = vadd.f32 %v657_v14, %v175_v43  ;;  %v701_v46 = vadd.f32 %v657_v14, %v207_v44  ;;  %v507_v47 = vpop.f32.mrb[6].mxu0  ;;  %v515_v48 = vpop.f32.mrb[6].mxu1 }
  0xe8   :  { %543 = vpow2.f32 %v439_v37  ;;  %v444_v49 = vmul.f32 -1.442695, %v692_v41  ;;  %v452_v50 = vmul.f32 -1.442695, %v695_v42  ;;  %v706_v51 = vadd.f32 %v507_v47, %v657_v14  ;;  %v178_v52 = vpop.f32.mrb[7].mxu0  ;;  %v210_v53 = vpop.f32.mrb[7].mxu1 }
  0xe9   :  { %545 = vpow2.f32 %v447_v38  ;;  %v442_v54 = vmul.f32 -1.442695, %v698_v45  ;;  %v450_v55 = vmul.f32 -1.442695, %v701_v46  ;;  %v712_v10 = vadd.f32 %v515_v48, %v657_v14 }
  0xea   :  { %547 = vpow2.f32 %v444_v49  ;;  %v445_v56 = vmul.f32 -1.442695, %v706_v51  ;;  %v715_v13 = vadd.f32 %v657_v14, %v178_v52  ;;  %v718_v19 = vadd.f32 %v657_v14, %v210_v53 }
  0xeb   :  { %549 = vpow2.f32 %v452_v50  ;;  %v453_v26 = vmul.f32 -1.442695, %v712_v10 }
  0xec   :  { %v532_v57 = vpop.eup %531  ;;  %551 = vpow2.f32 %v442_v54  ;;  %v443_v31 = vmul.f32 -1.442695, %v715_v13  ;;  %v451_v14 = vmul.f32 -1.442695, %v718_v19 }
  0xed   :  { %v534_v58 = vpop.eup %533  ;;  %v272_v59 = vadd.f32 1.0, %v532_v57  ;;  %553 = vpow2.f32 %v450_v55 }
  0xee   :  { %v536_v60 = vpop.eup %535  ;;  %v280_v61 = vadd.f32 1.0, %v534_v58  ;;  %555 = vpow2.f32 %v445_v56 }
  0xef   :  { %v538_v62 = vpop.eup %537  ;;  %557 = vrcp.f32 %v272_v59  ;;  %v270_v63 = vadd.f32 1.0, %v536_v60 }
  0xf0   :  { %v540_v0 = vpop.eup %539  ;;  %559 = vrcp.f32 %v280_v61  ;;  %v278_v1 = vadd.f32 1.0, %v538_v62 }
  0xf1   :  { %v542_v2 = vpop.eup %541  ;;  %561 = vrcp.f32 %v270_v63  ;;  %v273_v3 = vadd.f32 1.0, %v540_v0 }
  0xf2   :  { %v544_v4 = vpop.eup %543  ;;  %563 = vrcp.f32 %v278_v1  ;;  %v281_v5 = vadd.f32 1.0, %v542_v2 }
  0xf3   :  { %v546_v6 = vpop.eup %545  ;;  %565 = vrcp.f32 %v273_v3  ;;  %v271_v7 = vadd.f32 1.0, %v544_v4 }
  0xf4   :  { %v548_v8 = vpop.eup %547  ;;  %567 = vrcp.f32 %v281_v5  ;;  %v279_v9 = vadd.f32 1.0, %v546_v6 }
  0xf5   :  { %v550_v11 = vpop.eup %549  ;;  %569 = vrcp.f32 %v271_v7  ;;  %v276_v12 = vadd.f32 1.0, %v548_v8 }
  0xf6   :  { %v552_v15 = vpop.eup %551  ;;  %571 = vrcp.f32 %v279_v9  ;;  %v284_v16 = vadd.f32 1.0, %v550_v11 }
  0xf7   :  { %v554_v20 = vpop.eup %553  ;;  %573 = vrcp.f32 %v276_v12  ;;  %v274_v23 = vadd.f32 1.0, %v552_v15 }
  0xf8   :  { %v556_v24 = vpop.eup %555  ;;  %575 = vrcp.f32 %v284_v16  ;;  %v282_v25 = vadd.f32 1.0, %v554_v20 }
  0xf9   :  { %v558_v29 = vpop.eup %557  ;;  %577 = vrcp.f32 %v274_v23  ;;  %v277_v30 = vadd.f32 1.0, %v556_v24 }
  0xfa   :  { %v560_v32 = vpop.eup %559  ;;  %v320_v35 = vmul.f32 %v558_v29, %v660_v17  ;;  %579 = vrcp.f32 %v282_v25 }
  0xfb   :  { %v562_v36 = vpop.eup %561  ;;  %v328_v37 = vmul.f32 %v560_v32, %v663_v18  ;;  %581 = vrcp.f32 %v277_v30 }
  0xfc   :  { %v564_v38 = vpop.eup %563  ;;  %v472_v39 = vpack.c.bf16 %v320_v35, %v320_v35  ;;  %v318_v40 = vmul.f32 %v562_v36, %v666_v21  ;;  %583 = vpow2.f32 %v453_v26 }
  0xfd   :  { %v566_v43 = vpop.eup %565  ;;  %v480_v44 = vpack.c.bf16 %v328_v37, %v328_v37  ;;  %v326_v47 = vmul.f32 %v564_v38, %v669_v22  ;;  %585 = vpow2.f32 %v443_v31 }
  0xfe   :  { %v568_v48 = vpop.eup %567  ;;  %401 = vst.msk [vmem:[%s806_s3 + $0x8] sm:$0xf] %vm398_vm3, %v472_v39  ;;  %v470_v17 = vpack.c.bf16 %v318_v40, %v318_v40  ;;  %v321_v18 = vmul.f32 %v566_v43, %v674_v27  ;;  %587 = vpow2.f32 %v451_v14 }
  0xff   :  { %v570_v49 = vpop.eup %569  ;;  %409 = vst.msk [vmem:[%s806_s3 + $0x28] sm:$0xf] %vm398_vm3, %v480_v44  ;;  %v478_v21 = vpack.c.bf16 %v326_v47, %v326_v47  ;;  %v329_v22 = vmul.f32 %v568_v48, %v677_v28 }
 0x100   :  { %v572_v50 = vpop.eup %571  ;;  %399 = vst.msk [vmem:[%s806_s3] sm:$0xf] %vm398_vm3, %v470_v17  ;;  %v473_v52 = vpack.c.bf16 %v321_v18, %v321_v18  ;;  %v319_v53 = vmul.f32 %v570_v49, %v682_v33 }
 0x101   :  { %v574_v27 = vpop.eup %573  ;;  %407 = vst.msk [vmem:[%s806_s3 + $0x20] sm:$0xf] %vm398_vm3, %v478_v21  ;;  %v481_v54 = vpack.c.bf16 %v329_v22, %v329_v22  ;;  %v327_v55 = vmul.f32 %v572_v50, %v685_v34 }
 0x102   :  { %v576_v56 = vpop.eup %575  ;;  %402 = vst.msk [vmem:[%s806_s3 + $0xc] sm:$0xf] %vm398_vm3, %v473_v52  ;;  %v471_v28 = vpack.c.bf16 %v319_v53, %v319_v53  ;;  %v324_v57 = vmul.f32 %v574_v27, %v692_v41 }
 0x103   :  { %v578_v58 = vpop.eup %577  ;;  %410 = vst.msk [vmem:[%s806_s3 + $0x2c] sm:$0xf] %vm398_vm3, %v481_v54  ;;  %v479_v33 = vpack.c.bf16 %v327_v55, %v327_v55  ;;  %v332_v59 = vmul.f32 %v576_v56, %v695_v42 }
 0x104   :  { %v580_v60 = vpop.eup %579  ;;  %400 = vst.msk [vmem:[%s806_s3 + $0x4] sm:$0xf] %vm398_vm3, %v471_v28  ;;  %v476_v34 = vpack.c.bf16 %v324_v57, %v324_v57  ;;  %v322_v61 = vmul.f32 %v578_v58, %v698_v45 }
 0x105   :  { %v582_v62 = vpop.eup %581  ;;  %408 = vst.msk [vmem:[%s806_s3 + $0x24] sm:$0xf] %vm398_vm3, %v479_v33  ;;  %v484_v41 = vpack.c.bf16 %v332_v59, %v332_v59  ;;  %v330_v63 = vmul.f32 %v580_v60, %v701_v46 }
 0x106   :  { %v584_v0 = vpop.eup %583  ;;  %405 = vst.msk [vmem:[%s806_s3 + $0x18] sm:$0xf] %vm398_vm3, %v476_v34  ;;  %v474_v42 = vpack.c.bf16 %v322_v61, %v322_v61  ;;  %v325_v1 = vmul.f32 %v582_v62, %v706_v51 }
 0x107   :  { %v586_v2 = vpop.eup %585  ;;  %413 = vst.msk [vmem:[%s806_s3 + $0x38] sm:$0xf] %vm398_vm3, %v484_v41  ;;  %v482_v45 = vpack.c.bf16 %v330_v63, %v330_v63  ;;  %v285_v3 = vadd.f32 1.0, %v584_v0 }
 0x108   :  { %v588_v4 = vpop.eup %587  ;;  %403 = vst.msk [vmem:[%s806_s3 + $0x10] sm:$0xf] %vm398_vm3, %v474_v42  ;;  %v477_v46 = vpack.c.bf16 %v325_v1, %v325_v1  ;;  %v275_v5 = vadd.f32 1.0, %v586_v2 }
 0x109   :  { %411 = vst.msk [vmem:[%s806_s3 + $0x30] sm:$0xf] %vm398_vm3, %v482_v45  ;;  %589 = vrcp.f32 %v285_v3  ;;  %v283_v51 = vadd.f32 1.0, %v588_v4 }
 0x10a   :  { %406 = vst.msk [vmem:[%s806_s3 + $0x1c] sm:$0xf] %vm398_vm3, %v477_v46  ;;  %591 = vrcp.f32 %v275_v5 }
 0x10b   :  { %593 = vrcp.f32 %v283_v51 }
 0x113   :  { %v590_v6 = vpop.eup %589 }
 0x114   :  { %v592_v7 = vpop.eup %591  ;;  %v333_v8 = vmul.f32 %v590_v6, %v712_v10 }
 0x115   :  { %v594_v9 = vpop.eup %593  ;;  %v323_v11 = vmul.f32 %v592_v7, %v715_v13 }
 0x116   :  { %v485_v12 = vpack.c.bf16 %v333_v8, %v333_v8  ;;  %v331_v15 = vmul.f32 %v594_v9, %v718_v19 }
 0x117   :  { %v475_v16 = vpack.c.bf16 %v323_v11, %v323_v11 }
 0x118   :  { %414 = vst.msk [vmem:[%s806_s3 + $0x3c] sm:$0xf] %vm398_vm3, %v485_v12  ;;  %v483_v20 = vpack.c.bf16 %v331_v15, %v331_v15 }
 0x119   :  { %404 = vst.msk [vmem:[%s806_s3 + $0x14] sm:$0xf] %vm398_vm3, %v475_v16 }
 0x11a   :  { %412 = vst.msk [vmem:[%s806_s3 + $0x34] sm:$0xf] %vm398_vm3, %v483_v20 }

</bundles_post_ra>
